<compile_context>
chip_gen: v6e
topology: v6e:2x2x1
jax: 0.10.0
libtpu: 0.0.40
codegen_flags: <defaults>
</compile_context>

<pallas_src>
import jax
import jax.numpy as jnp
from jax import lax
from jax.experimental import pallas as pl
from jax.experimental.pallas import tpu as pltpu


# --------------------------------------------------------------------------
# Kernel
# --------------------------------------------------------------------------
def _masked_sums_kernel(x_ref, mask_ref, sx_ref, sx2_ref, sx_acc, sx2_acc):
    """Accumulate per-channel masked sum(x) / sum(x^2) over (B, T) tiles.

    Grid = (segment, C-block, T-block); T-block (axis 2) is the reduction axis.
    sx_acc / sx2_acc are (tC, 128) f32 VMEM scratch accumulators: per tile we
    fold the batch axis and the tT/128 lane groups into them with pure VPU
    vreg adds; the cross-lane (XLU) reduce runs once, at the last T-block.
    """
    t = pl.program_id(2)
    B, tC, tT = x_ref.shape
    ng = tT // 128                         # lane groups per tile (tT % 128 == 0)

    @pl.when(t == 0)
    def _init():
        sx_acc[...] = jnp.zeros_like(sx_acc)
        sx2_acc[...] = jnp.zeros_like(sx2_acc)

    def group_body(g, carry):
        off = pl.multiple_of(g * 128, 128)           # aligned lane-group offset
        psum = None
        psum2 = None
        for b in range(B):                            # small static unroll
            xg = x_ref[b, :, pl.ds(off, 128)].astype(jnp.float32)   # (tC, 128)
            mg = mask_ref[pl.ds(b, 1), pl.ds(off, 128)]             # (1, 128)
            xm = xg * mg                              # masked x
            x2m = xm * xg                             # reuse masked product
            if psum is None:
                psum, psum2 = xm, x2m
            else:
                psum, psum2 = psum + xm, psum2 + x2m
        # One scratch read-modify-write per lane group (pure VPU adds).
        sx_acc[...] += psum
        sx2_acc[...] += psum2
        return carry

    lax.fori_loop(0, ng, group_body, 0)

    @pl.when(t == pl.num_programs(2) - 1)
    def _finalize():
        # Single cross-lane (XLU) reduce per (segment, C-block).
        sx_ref[...] = jnp.sum(sx_acc[...], axis=1, keepdims=True)[None]
        sx2_ref[...] = jnp.sum(sx2_acc[...], axis=1, keepdims=True)[None]


# --------------------------------------------------------------------------
# Tiling helpers
# --------------------------------------------------------------------------
def _round_up(v, m):
    return ((v + m - 1) // m) * m


def _x_tile_budget_bytes():
    """Generation-aware x-tile budget (kept well inside scoped/physical VMEM)."""
    try:
        cap = int(pltpu.get_tpu_info().vmem_capacity_bytes)
    except Exception:
        cap = 64 << 20
    # v5e / v6e have 128 MiB physical VMEM -> roomier tiles; v7x (64 MiB) and
    # unknown chips stay more conservative.
    return (8 << 20) if cap >= (128 << 20) else (6 << 20)


def _pick_channel_tile(C):
    """Prefer >=2 lane-dense (multiple-of-128) channel blocks so the leading
    parallel grid axes can be sharded across TensorCores (v7x)."""
    if C % 128 == 0 and C >= 256:
        best = None
        tc = 128
        while tc <= C // 2:
            if C % tc == 0:
                best = tc
            tc += 128
        if best is not None:
            return best
    return C


def _pick_time_tile(B, tC, T, itemsize, *, max_bytes):
    """Largest multiple-of-128 divisor of T whose x tile fits max_bytes.
    T is already a multiple of 128. Falls back to 128 if nothing fits
    (vmem_limit_bytes is then sized from the actual tile)."""
    best = 128
    tt = 128
    while tt <= T:
        if T % tt == 0 and B * tC * tt * itemsize <= max_bytes:
            best = tt
        tt += 128
    return best


# --------------------------------------------------------------------------
# Wrapper
# --------------------------------------------------------------------------
def norm_reg_loss(x, mask, lambda_reg=1.0):
    """Pallas implementation of NormRegLoss.forward. Returns a scalar f32."""
    B, C, T = x.shape
    mask_f = mask.astype(jnp.float32)                 # (B, T)

    # Pad T to a multiple of 128; zero mask makes the padding numerically free.
    T_pad = max(128, _round_up(T, 128))
    if T_pad != T:
        x_p = jnp.pad(x, ((0, 0), (0, 0), (0, T_pad - T)))
        mask_p = jnp.pad(mask_f, ((0, 0), (0, T_pad - T)))
    else:
        x_p, mask_p = x, mask_f

    itemsize = x.dtype.itemsize
    budget = _x_tile_budget_bytes()

    tC = _pick_channel_tile(C)
    # Shrink tC if even a minimal (tT=128) tile would exceed the budget.
    while B * tC * 128 * itemsize > budget and tC % 256 == 0:
        tC //= 2
    nC = C // tC

    # v7x: guarantee >=2 blocks on a leading "parallel" axis. If C yields a
    # single block, split T into two independent halves (partial sums reduced
    # in the epilogue).
    if nC == 1 and T_pad % 256 == 0:
        S, seg_T = 2, T_pad // 2
    else:
        S, seg_T = 1, T_pad

    tT = _pick_time_tile(B, tC, seg_T, itemsize, max_bytes=budget)
    nT = seg_T // tT
    grid = (S, nC, nT)

    # Explicit VMEM limit: double-buffered inputs + outputs + scratch + slack.
    x_tile_bytes = B * _round_up(tC, 8) * tT * itemsize
    mask_tile_bytes = _round_up(B, 8) * tT * 4
    scratch_bytes = 2 * _round_up(tC, 8) * 128 * 4
    out_bytes = 2 * 2 * _round_up(tC, 8) * 128 * 4
    need = 2 * x_tile_bytes + 2 * mask_tile_bytes + scratch_bytes + out_bytes
    vmem_limit = int(min(need + (8 << 20), 48 << 20))

    sx_raw, sx2_raw = pl.pallas_call(
        _masked_sums_kernel,
        out_shape=(
            jax.ShapeDtypeStruct((S, C, 1), jnp.float32),
            jax.ShapeDtypeStruct((S, C, 1), jnp.float32),
        ),
        grid_spec=pltpu.PrefetchScalarGridSpec(
            num_scalar_prefetch=0,
            grid=grid,
            in_specs=[
                pl.BlockSpec((B, tC, tT), lambda s, c, t: (0, c, s * nT + t)),
                pl.BlockSpec((B, tT), lambda s, c, t: (0, s * nT + t)),
            ],
            out_specs=[
                pl.BlockSpec((1, tC, 1), lambda s, c, t: (s, c, 0)),
                pl.BlockSpec((1, tC, 1), lambda s, c, t: (s, c, 0)),
            ],
            scratch_shapes=[
                pltpu.VMEM((tC, 128), jnp.float32),
                pltpu.VMEM((tC, 128), jnp.float32),
            ],
        ),
        compiler_params=pltpu.CompilerParams(
            dimension_semantics=("parallel", "parallel", "arbitrary"),
            vmem_limit_bytes=vmem_limit,
        ),
    )(x_p, mask_p)

    # O(C) epilogue in plain JAX (reduce the S segment partials, finish loss).
    # NOTE: like the PyTorch reference, an all-zero mask produces Inf/NaN.
    sx = jnp.sum(sx_raw[:, :, 0], axis=0)             # (C,)
    sx2 = jnp.sum(sx2_raw[:, :, 0], axis=0)           # (C,)
    msum = jnp.sum(mask_f)
    mean = sx / msum
    var = sx2 / msum - mean * mean
    mean_loss = jnp.mean(mean * mean)
    var_loss = jnp.mean((var - 1.0) ** 2)
    return (lambda_reg * (mean_loss + var_loss)).astype(jnp.float32)


# --------------------------------------------------------------------------
# Pure-JAX reference (mirrors the PyTorch forward)
# --------------------------------------------------------------------------
def _reference(x, mask, lambda_reg=1.0):
    x = x.astype(jnp.float32)
    mask = mask.astype(jnp.float32)
    m_e = mask[:, None, :]                                         # (B, 1, T)
    denom = jnp.sum(m_e, axis=(0, 2), keepdims=True)
    mean = jnp.sum(x * m_e, axis=(0, 2), keepdims=True) / denom
    var = jnp.sum(x * x * m_e, axis=(0, 2), keepdims=True) / denom - mean ** 2
    return lambda_reg * (jnp.mean(mean ** 2) + jnp.mean((var - 1.0) ** 2))


def _make_mask(lengths, T):
    t_idx = jnp.arange(T, dtype=jnp.int32)[None, :]
    return (t_idx < lengths[:, None]).astype(jnp.float32)


if __name__ == "__main__":
    key = jax.random.PRNGKey(0)
    k1, k2, k3 = jax.random.split(key, 3)

    # 1) Small shapes consistent with the module (padding path, single block).
    B, C, T = 2, 4, 16
    x = jax.random.normal(k1, (B, C, T), dtype=jnp.float32)
    mask = _make_mask(jnp.array([12, 9], dtype=jnp.int32), T)
    loss = norm_reg_loss(x, mask, lambda_reg=1.0)
    jax.block_until_ready(loss)
    ref = _reference(x, mask, lambda_reg=1.0)
    assert jnp.allclose(loss, ref, atol=1e-5, rtol=1e-4), (loss, ref)

    # 2) Larger bf16 case exercising the multi-C-block ("parallel") path.
    B2, C2, T2 = 2, 256, 512
    x2 = jax.random.normal(k2, (B2, C2, T2), dtype=jnp.float32).astype(jnp.bfloat16)
    mask2 = _make_mask(jnp.array([400, 317], dtype=jnp.int32), T2)
    loss2 = norm_reg_loss(x2, mask2, lambda_reg=0.5)
    jax.block_until_ready(loss2)
    ref2 = _reference(x2, mask2, lambda_reg=0.5)
    assert jnp.allclose(loss2, ref2, atol=5e-4, rtol=5e-3), (loss2, ref2)

    # 3) Non-128-aligned T + single C block: exercises padding and the
    #    leading size-2 parallel T-segment split (v7x 2-TC path).
    B3, C3, T3 = 2, 64, 400
    x3 = jax.random.normal(k3, (B3, C3, T3), dtype=jnp.float32)
    mask3 = _make_mask(jnp.array([380, 250], dtype=jnp.int32), T3)
    loss3 = norm_reg_loss(x3, mask3, lambda_reg=2.0)
    jax.block_until_ready(loss3)
    ref3 = _reference(x3, mask3, lambda_reg=2.0)
    assert jnp.allclose(loss3, ref3, atol=1e-5, rtol=1e-4), (loss3, ref3)

    print("KERNEL_OK")
</pallas_src>

<mosaic_0001>
module attributes {stable_mosaic.version = 11 : i64} {
  func.func @_masked_sums_kernel(%arg0: i32, %arg1: i32, %arg2: i32, %arg3: memref<2x4x128xf32, #tpu.memory_space<vmem>>, %arg4: memref<2x128xf32, #tpu.memory_space<vmem>>, %arg5: memref<1x4x1xf32, #tpu.memory_space<vmem>>, %arg6: memref<1x4x1xf32, #tpu.memory_space<vmem>>, %arg7: memref<4x128xf32, #tpu.memory_space<vmem>>, %arg8: memref<4x128xf32, #tpu.memory_space<vmem>>) attributes {dimension_semantics = [#tpu.dimension_semantics<parallel>, #tpu.dimension_semantics<parallel>, #tpu.dimension_semantics<arbitrary>], iteration_bounds = array<i64: 1, 1, 1>, scalar_prefetch = 0 : i64, scratch_operands = 2 : i64, tpu.core_type = #tpu.core_type<tc>, window_params = [{transform_indices = @transform_0, window_bounds = array<i64: 2, 4, 128>}, {transform_indices = @transform_1, window_bounds = array<i64: 2, 128>}, {transform_indices = @transform_2, window_bounds = array<i64: 1, 4, 1>}, {transform_indices = @transform_3, window_bounds = array<i64: 1, 4, 1>}]} {
    %c0_i32 = arith.constant 0 : i32
    %0 = arith.cmpi eq, %arg2, %c0_i32 : i32
    %1 = arith.extui %0 : i1 to i32
    %c0_i32_0 = arith.constant 0 : i32
    %2 = arith.cmpi ne, %1, %c0_i32_0 : i32
    scf.if %2 {
      %cst = arith.constant 0.000000e+00 : f32
      %32 = vector.broadcast %cst : f32 to vector<4x128xf32>
      %c0_16 = arith.constant 0 : index
      %c0_17 = arith.constant 0 : index
      %33 = vector.load %arg7[%c0_16, %c0_17] : memref<4x128xf32, #tpu.memory_space<vmem>>, vector<4x128xf32>
      tpu.vector_store %arg7[%c0_16, %c0_17], %32 {strides = array<i32>} : memref<4x128xf32, #tpu.memory_space<vmem>>, vector<4x128xf32>,
      %cst_18 = arith.constant 0.000000e+00 : f32
      %34 = vector.broadcast %cst_18 : f32 to vector<4x128xf32>
      %c0_19 = arith.constant 0 : index
      %c0_20 = arith.constant 0 : index
      %35 = vector.load %arg8[%c0_19, %c0_20] : memref<4x128xf32, #tpu.memory_space<vmem>>, vector<4x128xf32>
      tpu.vector_store %arg8[%c0_19, %c0_20], %34 {strides = array<i32>} : memref<4x128xf32, #tpu.memory_space<vmem>>, vector<4x128xf32>,
    } else {
    }
    %c0_i32_1 = arith.constant 0 : i32
    %c128_i32 = arith.constant 128 : i32
    %3 = arith.muli %c0_i32_1, %c128_i32 : i32
    %4 = tpu.assume_multiple %3, 128 : i32
    %c0 = arith.constant 0 : index
    %c0_2 = arith.constant 0 : index
    %5 = arith.index_cast %4 : i32 to index
    %6 = vector.load %arg3[%c0, %c0_2, %5] : memref<2x4x128xf32, #tpu.memory_space<vmem>>, vector<1x4x128xf32>
    %7 = vector.shape_cast %6 : vector<1x4x128xf32> to vector<4x128xf32>
    %c0_3 = arith.constant 0 : index
    %8 = arith.index_cast %4 : i32 to index
    %9 = vector.load %arg4[%c0_3, %8] : memref<2x128xf32, #tpu.memory_space<vmem>>, vector<1x128xf32>
    %10 = vector.broadcast %9 : vector<1x128xf32> to vector<4x128xf32>
    %11 = arith.mulf %7, %10 : vector<4x128xf32>
    %12 = arith.mulf %11, %7 : vector<4x128xf32>
    %c1 = arith.constant 1 : index
    %c0_4 = arith.constant 0 : index
    %13 = arith.index_cast %4 : i32 to index
    %14 = vector.load %arg3[%c1, %c0_4, %13] : memref<2x4x128xf32, #tpu.memory_space<vmem>>, vector<1x4x128xf32>
    %15 = vector.shape_cast %14 : vector<1x4x128xf32> to vector<4x128xf32>
    %c1_5 = arith.constant 1 : index
    %16 = arith.index_cast %4 : i32 to index
    %17 = vector.load %arg4[%c1_5, %16] : memref<2x128xf32, #tpu.memory_space<vmem>>, vector<1x128xf32>
    %18 = vector.broadcast %17 : vector<1x128xf32> to vector<4x128xf32>
    %19 = arith.mulf %15, %18 : vector<4x128xf32>
    %20 = arith.mulf %19, %15 : vector<4x128xf32>
    %21 = arith.addf %11, %19 : vector<4x128xf32>
    %22 = arith.addf %12, %20 : vector<4x128xf32>
    %c0_6 = arith.constant 0 : index
    %c0_7 = arith.constant 0 : index
    %23 = vector.load %arg7[%c0_6, %c0_7] : memref<4x128xf32, #tpu.memory_space<vmem>>, vector<4x128xf32>
    %24 = arith.addf %23, %21 : vector<4x128xf32>
    %c0_8 = arith.constant 0 : index
    %c0_9 = arith.constant 0 : index
    %25 = vector.load %arg7[%c0_8, %c0_9] : memref<4x128xf32, #tpu.memory_space<vmem>>, vector<4x128xf32>
    tpu.vector_store %arg7[%c0_8, %c0_9], %24 {strides = array<i32>} : memref<4x128xf32, #tpu.memory_space<vmem>>, vector<4x128xf32>,
    %c0_10 = arith.constant 0 : index
    %c0_11 = arith.constant 0 : index
    %26 = vector.load %arg8[%c0_10, %c0_11] : memref<4x128xf32, #tpu.memory_space<vmem>>, vector<4x128xf32>
    %27 = arith.addf %26, %22 : vector<4x128xf32>
    %c0_12 = arith.constant 0 : index
    %c0_13 = arith.constant 0 : index
    %28 = vector.load %arg8[%c0_12, %c0_13] : memref<4x128xf32, #tpu.memory_space<vmem>>, vector<4x128xf32>
    tpu.vector_store %arg8[%c0_12, %c0_13], %27 {strides = array<i32>} : memref<4x128xf32, #tpu.memory_space<vmem>>, vector<4x128xf32>,
    %c1_i32 = arith.constant 1 : i32
    %c0_i32_14 = arith.constant 0 : i32
    %29 = arith.cmpi eq, %arg2, %c0_i32_14 : i32
    %30 = arith.extui %29 : i1 to i32
    %c0_i32_15 = arith.constant 0 : i32
    %31 = arith.cmpi ne, %30, %c0_i32_15 : i32
    scf.if %31 {
      %c0_16 = arith.constant 0 : index
      %c0_17 = arith.constant 0 : index
      %32 = vector.load %arg7[%c0_16, %c0_17] : memref<4x128xf32, #tpu.memory_space<vmem>>, vector<4x128xf32>
      %cst = arith.constant dense<0.000000e+00> : vector<4xf32>
      %33 = vector.multi_reduction <add>, %32, %cst [1] : vector<4x128xf32> to vector<4xf32>
      %34 = vector.shape_cast %33 : vector<4xf32> to vector<4x1xf32>
      %35 = vector.shape_cast %34 : vector<4x1xf32> to vector<1x4x1xf32>
      %c0_18 = arith.constant 0 : index
      %c0_19 = arith.constant 0 : index
      %c0_20 = arith.constant 0 : index
      %36 = vector.load %arg5[%c0_18, %c0_19, %c0_20] : memref<1x4x1xf32, #tpu.memory_space<vmem>>, vector<1x4x1xf32>
      tpu.vector_store %arg5[%c0_18, %c0_19, %c0_20], %35 {strides = array<i32>} : memref<1x4x1xf32, #tpu.memory_space<vmem>>, vector<1x4x1xf32>,
      %c0_21 = arith.constant 0 : index
      %c0_22 = arith.constant 0 : index
      %37 = vector.load %arg8[%c0_21, %c0_22] : memref<4x128xf32, #tpu.memory_space<vmem>>, vector<4x128xf32>
      %cst_23 = arith.constant dense<0.000000e+00> : vector<4xf32>
      %38 = vector.multi_reduction <add>, %37, %cst_23 [1] : vector<4x128xf32> to vector<4xf32>
      %39 = vector.shape_cast %38 : vector<4xf32> to vector<4x1xf32>
      %40 = vector.shape_cast %39 : vector<4x1xf32> to vector<1x4x1xf32>
      %c0_24 = arith.constant 0 : index
      %c0_25 = arith.constant 0 : index
      %c0_26 = arith.constant 0 : index
      %41 = vector.load %arg6[%c0_24, %c0_25, %c0_26] : memref<1x4x1xf32, #tpu.memory_space<vmem>>, vector<1x4x1xf32>
      tpu.vector_store %arg6[%c0_24, %c0_25, %c0_26], %40 {strides = array<i32>} : memref<1x4x1xf32, #tpu.memory_space<vmem>>, vector<1x4x1xf32>,
    } else {
    }
    return
  }
  func.func @transform_0(%arg0: i32, %arg1: i32, %arg2: i32) -> (i32, i32, i32) {
    %c1_i32 = arith.constant 1 : i32
    %0 = arith.muli %arg0, %c1_i32 : i32
    %1 = arith.addi %0, %arg2 : i32
    %c0_i32 = arith.constant 0 : i32
    %c0_i32_0 = arith.constant 0 : i32
    return %c0_i32, %arg1, %1 : i32, i32, i32
  }
  func.func @transform_1(%arg0: i32, %arg1: i32, %arg2: i32) -> (i32, i32) {
    %c1_i32 = arith.constant 1 : i32
    %0 = arith.muli %arg0, %c1_i32 : i32
    %1 = arith.addi %0, %arg2 : i32
    %c0_i32 = arith.constant 0 : i32
    %c0_i32_0 = arith.constant 0 : i32
    return %c0_i32, %1 : i32, i32
  }
  func.func @transform_2(%arg0: i32, %arg1: i32, %arg2: i32) -> (i32, i32, i32) {
    %c0_i32 = arith.constant 0 : i32
    %c0_i32_0 = arith.constant 0 : i32
    return %arg0, %arg1, %c0_i32 : i32, i32, i32
  }
  func.func @transform_3(%arg0: i32, %arg1: i32, %arg2: i32) -> (i32, i32, i32) {
    %c0_i32 = arith.constant 0 : i32
    %c0_i32_0 = arith.constant 0 : i32
    return %arg0, %arg1, %c0_i32 : i32, i32, i32
  }
}

</mosaic_0001>

<bundles_post_ra>
// kernel: tpu_custom_call.1
= control target key start
LH: loop header
LB: loop body
LE: loop exit
PB: predicated region body
PF: predicated region fallthrough
CT: control target
= control target key end

     0   :  { %9 = vsyncpa [#allocation5], 0  ;;  %s193_s0 = inlined_call_operand.hbm [shape: f32[2,4,128], index: 0, kind: input, shape index: {}]   ;;  %s194_s1 = inlined_call_operand.hbm [shape: f32[2,128], index: 1, kind: input, shape index: {}]   ;;  %s195_s2 = inlined_call_operand.vmem [shape: f32[1,4,1], index: 2, kind: output, shape index: {0}]   ;;  %s196_s3 = inlined_call_operand.vmem [shape: f32[1,4,1], index: 3, kind: output, shape index: {1}]  }
   0x1   :  { %10 = vsyncpa [#allocation7], 0  ;;  %s156_s12 = smov [#allocation4]  }
   0x2   :  { %s19_s13 = sshll.u32 %s156_s12, 4  ;;  %s20_s13 = int_to_ptr.vmem [resolvable:$true] %s19_s13 }
   0x3   :  { %s120_s14 = scalar_lea.vmem %s20_s13, 128  ;;  %p125_p1 = scmp.lt.s32.totalorder %s20_s13, %s20_s13 }
   0x4   :  { %p121_p0 = scmp.ne.s32.totalorder %s20_s13, %s120_s14  ;;  %p126_p2 = scmp.lt.s32.totalorder %s120_s14, %s120_s14 }
   0x6   :  { %p127_p3 = por %p126_p2, %p125_p1 }
   0x8   :  { %p128_p4 = pnand %p127_p3, %p121_p0 }
   0xa   :  { %131 = shalt.err (!%p128_p4)
}
   0xb   :  { %s157_s15 = smov 64   ;;  %s158_s16 = smov 4  }
   0xc   :  { %25 = dma.hbm_to_vmem [thread:$0]  %s193_s0, 128, %s20_s13, [#allocation5], %s157_s15, %s157_s15, %s158_s16  }
   0xd   :  { %s159_s19 = smov [#allocation6]  }
   0xe   :  { %s35_s20 = sshll.u32 %s159_s19, 4  ;;  %s36_s20 = int_to_ptr.vmem [resolvable:$true] %s35_s20 }
   0xf   :  { %s140_s21 = scalar_lea.vmem %s36_s20, 32  ;;  %p145_p6 = scmp.lt.s32.totalorder %s36_s20, %s36_s20 }
  0x10   :  { %p141_p5 = scmp.ne.s32.totalorder %s36_s20, %s140_s21  ;;  %p146_p7 = scmp.lt.s32.totalorder %s140_s21, %s140_s21 }
  0x12   :  { %p147_p8 = por %p146_p7, %p145_p6 }
  0x14   :  { %p148_p9 = pnand %p147_p8, %p141_p5 }
  0x16   :  { %151 = shalt.err (!%p148_p9)
}
  0x17   :  { %38 = dma.hbm_to_vmem [thread:$0]  %s194_s1, 32, %s36_s20, [#allocation7]  }
  0x18   :  { %152 = dma.done.wait [#allocation5], 128  }
  0x19   :  { %153 = vsyncadd [#allocation5], 4294967168 }
  0x1a   :  { %154 = dma.done.wait [#allocation7], 32  }
  0x1b   :  { %155 = vsyncadd [#allocation7], 4294967264  ;;  %v160_v0 = vmov 0.0   ;;  %v53_v1 = vld [vmem:[#allocation4] sm:$0xf]  ;;  %vm83_vm0 = vcmask 1043456  }
  0x1c   :  { %51 = vst [vmem:[#allocation2] sm:$0xf] %v160_v0  ;;  %52 = vst [vmem:[#allocation3] sm:$0xf] %v160_v0  ;;  %v105_v2 = vld [vmem:[#allocation6] ss:$0 sm:$0xff] }
  0x1d   :  { %v63_v3 = vld [vmem:[#allocation4 + $0x4] sm:$0xf]  ;;  %v59_v4 = vmul.f32 %v105_v2, %v53_v1  ;;  %v106_v5 = vld [vmem:[#allocation6 + $0x1] ss:$0 sm:$0xff]  ;;  %vm87_vm1 = vcmask 3072  }
  0x1e   :  { %v69_v6 = vmul.f32 %v106_v5, %v63_v3 }
  0x1f   :  { %v60_v8 = vmul.f32 %v59_v4, %v53_v1 }
  0x20   :  { %v71_v9 = vadd.f32 %v69_v6, %v59_v4  ;;  %v70_v10 = vmul.f32 %v69_v6, %v63_v3 }
  0x22   :  { %v72_v13 = vadd.f32 %v70_v10, %v60_v8 }
  0x23   :  { %v73_v7 = vld [vmem:[#allocation2] sm:$0xf]  ;;  %v76_v11 = vld [vmem:[#allocation3] sm:$0xf] }
  0x24   :  { %v74_v12 = vadd.f32 %v73_v7, %v71_v9  ;;  %v77_v14 = vadd.f32 %v76_v11, %v72_v13 }
  0x26   :  { %75 = vst [vmem:[#allocation2] sm:$0xf] %v74_v12  ;;  %78 = vst [vmem:[#allocation3] sm:$0xf] %v77_v14 }
  0x2d   :  { %v82_v15 = vld [vmem:[#allocation2] sm:$0xf]  ;;  %v89_v17 = vld [vmem:[#allocation3] sm:$0xf] }
  0x2e   :  { %v84_v16 = vsel %vm83_vm0, %v82_v15, 0.0  ;;  %v90_v18 = vsel %vm83_vm0, %v89_v17, 0.0 }
  0x2f   :  { %85 = vadd.xlane.f32.xlu0 %v84_v16 }
  0x33   :  { %91 = vadd.xlane.f32.xlu0 %v90_v18 }
  0xb8   :  { %v86_v19 = vpop.xlane.xlu0 %85 }
  0xb9   :  { %88 = vst.msk [vmem:[%s195_s2] sm:$0xf] %vm87_vm1, %v86_v19 }
  0xbc   :  { %v92_v20 = vpop.xlane.xlu0 %91 }
  0xbd   :  { %93 = vst.msk [vmem:[%s196_s3] sm:$0xf] %vm87_vm1, %v92_v20 }
  0xbe   :  { %102 = vsyncpa [#allocation5], 1 }
  0xbf   :  { %103 = vsyncpa [#allocation7], 1 }

</bundles_post_ra>
